<compile_context>
chip_gen: v7x
topology: tpu7x:2x2x1
jax: 0.10.0
libtpu: 0.0.40
codegen_flags: <defaults>
</compile_context>

<pallas_src>
import functools

import numpy as np
import jax
import jax.numpy as jnp
from jax import lax
from jax.experimental import pallas as pl
from jax.experimental.pallas import tpu as pltpu


def _make_align_corners_matrix(out_size: int, in_size: int) -> np.ndarray:
    """(out_size, in_size) matrix reproducing 1-D linear interpolation with
    align_corners=True, as used by torch.nn.functional.interpolate(bilinear)."""
    w = np.zeros((out_size, in_size), dtype=np.float32)
    if out_size == 1 or in_size == 1:
        w[:, 0] = 1.0
        return w
    scale = (in_size - 1) / (out_size - 1)
    for j in range(out_size):
        s = j * scale
        i0 = min(max(int(np.floor(s)), 0), in_size - 1)
        i1 = min(i0 + 1, in_size - 1)
        frac = s - i0
        w[j, i0] += 1.0 - frac
        w[j, i1] += frac
    return w


def _vmem_capacity_bytes() -> int:
    try:
        info = pltpu.get_tpu_info()
        cap = getattr(info, "vmem_capacity_bytes", None)
        if cap:
            return int(cap)
    except Exception:
        pass
    return 64 * 1024 * 1024          # conservative (v7x per-TensorCore size)


def _largest_divisor_leq(n: int, cap: int) -> int:
    cap = int(max(1, min(cap, n)))
    for d in range(cap, 0, -1):
        if n % d == 0:
            return d
    return 1


def _loss_kernel(*refs, is_l1, do_interp, mm_dtype):
    if do_interp:
        x_ref, t_ref, wh_ref, wwt_ref = refs[:4]
        *out_refs, tmp_ref = refs[4:]
    else:
        x_ref, t_ref = refs[:2]
        out_refs = list(refs[2:])

    bt = x_ref.shape[0]
    Ho, Wo = t_ref.shape[1], t_ref.shape[2]
    step = pl.program_id(1)

    @pl.when(step == 0)
    def _init():
        for o in out_refs:
            o[...] = jnp.zeros_like(o)

    if do_interp:
        Hi, Wi = x_ref.shape[1], x_ref.shape[2]
        # Batched width resize: ONE MXU matmul over all bt images in the block.
        x_all = x_ref[...].astype(mm_dtype).reshape(bt * Hi, Wi)
        tmp = jnp.dot(x_all, wwt_ref[...], preferred_element_type=jnp.float32)
        tmp_ref[...] = tmp.reshape(bt, Hi, Wo).astype(mm_dtype)
        wh = wh_ref[...]                       # (Ho, Hi), hoisted out of the loop

    def body(b, accs):
        tb = t_ref[b].astype(jnp.float32)      # (Ho, Wo)
        if do_interp:
            # height resize: (Ho, Hi) @ (Hi, Wo) -> (Ho, Wo)
            ib = jnp.dot(wh, tmp_ref[b], preferred_element_type=jnp.float32)
        else:
            ib = x_ref[b].astype(jnp.float32)
        mask = tb > 0.0
        maskf = mask.astype(jnp.float32)
        if is_l1:
            # (x + eps) - (t + eps) == x - t : epsilons dropped.
            d = jnp.where(mask, jnp.abs(ib - tb), 0.0)
            parts = (d, maskf)
        else:
            # one log per pixel: log(x/t) == log(x) - log(t)
            g = jnp.where(mask, jnp.log((ib + 1e-8) / (tb + 1e-8)), 0.0)
            parts = (g, g * g, maskf)
        # per-image sublane (Ho) reduce -> tiny (1, Wo) running accumulators
        return tuple(a + jnp.sum(p, axis=0, keepdims=True)
                     for a, p in zip(accs, parts))

    accs = tuple(o[...] for o in out_refs)     # VMEM-resident output blocks
    accs = lax.fori_loop(0, bt, body, accs)
    for o, a in zip(out_refs, accs):
        o[...] = a


def loss_forward(inp, target, loss_name="SILog", interpolate=True,
                 images_per_step=None, n_cores=1, resize_dtype=None):
    """Equivalent of Loss(args).forward(input, target, mask=None, interpolate)."""
    # TODO(synk): the explicit-`mask` argument branch of Loss.forward (where the
    # supplied mask is used and no >0 masking / eps is applied) is not exposed.
    inp = jnp.asarray(inp)
    target = jnp.asarray(target)
    N, C, Hi, Wi = inp.shape
    Nt, Ct, Ho, Wo = target.shape
    assert (N, C) == (Nt, Ct)
    if not interpolate:
        assert (Hi, Wi) == (Ho, Wo)

    is_l1 = (loss_name == "L1")
    B = N * C
    x = inp.reshape(B, Hi, Wi)          # keep original dtype in HBM (bf16 friendly)
    t = target.reshape(B, Ho, Wo)

    # Resize-matmul dtype: never upcast bf16 inputs; f32 inputs stay f32 so the
    # numerics match the f32 reference (pass resize_dtype=jnp.bfloat16 to force).
    mm_dtype = np.dtype(resize_dtype) if resize_dtype is not None else x.dtype
    mm_itemsize = mm_dtype.itemsize

    # ---- images per grid step under a per-generation VMEM budget -------------
    in_img = Hi * Wi * x.dtype.itemsize
    t_img = Ho * Wo * t.dtype.itemsize
    tmp_img = Hi * Wo * mm_itemsize if interpolate else 0
    per_img = 2 * (in_img + t_img) + tmp_img       # double-buffered in/tgt + scratch

    vmem_cap = _vmem_capacity_bytes()
    vmem_limit = int(min(max(vmem_cap - (16 << 20), 32 << 20), 96 << 20))
    weight_bytes = 2 * (Ho * Hi + Wi * Wo) * mm_itemsize if interpolate else 0
    budget = max(4 << 20, vmem_limit // 2 - weight_bytes)

    bt_cap = max(1, min(budget // per_img, 64, B))
    if images_per_step is not None:
        bt_cap = max(1, min(bt_cap, int(images_per_step)))
    # bt divides B -> no host-side padding / whole-array copies, ever.
    bt = _largest_divisor_leq(B, bt_cap)

    n_chunks = B // bt
    n_cores = int(max(1, n_cores))
    while n_cores > 1 and n_chunks % n_cores != 0:
        n_cores -= 1
    steps = n_chunks // n_cores

    def batch_map(c, s):
        return (c * steps + s, 0, 0)

    in_arrays = [x, t]
    in_specs = [pl.BlockSpec((bt, Hi, Wi), batch_map),
                pl.BlockSpec((bt, Ho, Wo), batch_map)]
    scratch_shapes = []
    if interpolate:
        wh = jnp.asarray(_make_align_corners_matrix(Ho, Hi), dtype=mm_dtype)      # (Ho, Hi)
        wwt = jnp.asarray(_make_align_corners_matrix(Wo, Wi).T, dtype=mm_dtype)   # (Wi, Wo)
        in_arrays += [wh, wwt]
        in_specs += [pl.BlockSpec((Ho, Hi), lambda c, s: (0, 0)),
                     pl.BlockSpec((Wi, Wo), lambda c, s: (0, 0))]
        scratch_shapes = [pltpu.VMEM((bt, Hi, Wo), mm_dtype)]

    nq = 2 if is_l1 else 3                         # sum, [sum_sq], count
    out_shape = tuple(jax.ShapeDtypeStruct((n_cores, 1, Wo), jnp.float32)
                      for _ in range(nq))
    out_specs = [pl.BlockSpec((None, 1, Wo), lambda c, s: (c, 0, 0))
                 for _ in range(nq)]

    flops = 8 * B * Ho * Wo
    if interpolate:
        flops += 2 * B * (Hi * Wi * Wo + Hi * Wo * Ho)
    transc = 0 if is_l1 else B * Ho * Wo
    bytes_accessed = B * (in_img + t_img) + nq * n_cores * Wo * 4
    cost = pl.CostEstimate(flops=int(flops), transcendentals=int(transc),
                           bytes_accessed=int(bytes_accessed))

    if n_cores > 1:
        # v7x: actually split the leading axis across the two TensorCores.
        dims = (pltpu.CORE_PARALLEL, pltpu.ARBITRARY)
    else:
        dims = (pltpu.ARBITRARY, pltpu.ARBITRARY)

    kernel = functools.partial(_loss_kernel, is_l1=is_l1, do_interp=interpolate,
                               mm_dtype=mm_dtype)
    outs = pl.pallas_call(
        kernel,
        out_shape=out_shape,
        grid_spec=pltpu.PrefetchScalarGridSpec(
            num_scalar_prefetch=0,
            grid=(n_cores, steps),
            in_specs=in_specs,
            out_specs=out_specs,
            scratch_shapes=scratch_shapes,
        ),
        compiler_params=pltpu.CompilerParams(
            dimension_semantics=dims,
            vmem_limit_bytes=vmem_limit),
        cost_estimate=cost,
    )(*in_arrays)

    if is_l1:
        sums, cnts = outs
        n = jnp.sum(cnts)
        return jnp.sum(sums) / n
    sums, sqs, cnts = outs
    n = jnp.sum(cnts)                     # n == 0 or 1 -> nan/inf, as in reference
    mean_g = jnp.sum(sums) / n
    var_g = (jnp.sum(sqs) - n * mean_g * mean_g) / (n - 1.0)   # torch.var: unbiased
    var_g = jnp.maximum(var_g, 0.0)       # guard fp cancellation only
    return jnp.sqrt(var_g + 0.15 * mean_g * mean_g)


def _reference(inp, target, loss_name="SILog", interpolate=True):
    """Pure-JAX transliteration of the PyTorch forward (eager, dynamic shapes)."""
    inp = jnp.asarray(inp).astype(jnp.float32)
    target = jnp.asarray(target).astype(jnp.float32)
    _, _, Hi, Wi = inp.shape
    _, _, Ho, Wo = target.shape
    if interpolate:
        wh = jnp.asarray(_make_align_corners_matrix(Ho, Hi))
        ww = jnp.asarray(_make_align_corners_matrix(Wo, Wi))
        interp = jnp.einsum("oh,nchw,pw->ncop", wh, inp, ww)
    else:
        interp = inp
    mask = target > 0.0
    x = interp[mask] + 1e-8
    t = target[mask] + 1e-8
    if loss_name == "L1":
        return jnp.mean(jnp.abs(x - t))
    g = jnp.log(x) - jnp.log(t)
    Dg = jnp.var(g, ddof=1) + 0.15 * jnp.mean(g) ** 2
    return jnp.sqrt(Dg)


if __name__ == "__main__":
    key = jax.random.PRNGKey(0)
    k1, k2, k3 = jax.random.split(key, 3)

    # Depth-style inputs: strictly positive low-res prediction, partly-zero target.
    N, C = 4, 1
    Hi, Wi = 16, 64          # prediction resolution
    Ho, Wo = 32, 128         # target resolution (lane-dense: Wo multiple of 128)

    inp = jax.nn.softplus(jax.random.normal(k1, (N, C, Hi, Wi), jnp.float32)) + 0.1
    tgt = jax.nn.relu(jax.random.normal(k2, (N, C, Ho, Wo), jnp.float32))
    inp_full = jax.nn.softplus(jax.random.normal(k3, (N, C, Ho, Wo), jnp.float32)) + 0.1
    inp_bf16 = inp.astype(jnp.bfloat16)

    checks = [
        ("SILog/auto", loss_forward(inp, tgt, "SILog"),
         _reference(inp, tgt, "SILog"), 2e-3),
        ("L1/auto", loss_forward(inp, tgt, "L1"),
         _reference(inp, tgt, "L1"), 2e-3),
        # one image per step -> exercises multi-step accumulation across the grid
        ("SILog/bt1", loss_forward(inp, tgt, "SILog", images_per_step=1),
         _reference(inp, tgt, "SILog"), 2e-3),
        # non-dividing request rounds down to a divisor (bt=2) -> no padding path
        ("SILog/bt3", loss_forward(inp, tgt, "SILog", images_per_step=3),
         _reference(inp, tgt, "SILog"), 2e-3),
        # interpolate=False path (matmuls skipped at trace time)
        ("SILog/noresize", loss_forward(inp_full, tgt, "SILog", interpolate=False),
         _reference(inp_full, tgt, "SILog", interpolate=False), 2e-3),
        # bf16 prediction: resize matmuls run natively in bf16 (no upcast)
        ("SILog/bf16", loss_forward(inp_bf16, tgt, "SILog"),
         _reference(inp_bf16, tgt, "SILog"), 2e-2),
    ]

    for name, got, want, rtol in checks:
        got = np.asarray(jax.block_until_ready(got))
        want = np.asarray(want)
        assert np.allclose(got, want, rtol=rtol, atol=1e-5), (name, got, want)

    print("KERNEL_OK")
</pallas_src>

<mosaic_0001>
module attributes {stable_mosaic.version = 11 : i64} {
  func.func @_loss_kernel(%arg0: i32, %arg1: i32, %arg2: memref<4x16x64xf32, #tpu.memory_space<vmem>>, %arg3: memref<4x32x128xf32, #tpu.memory_space<vmem>>, %arg4: memref<32x16xf32, #tpu.memory_space<vmem>>, %arg5: memref<64x128xf32, #tpu.memory_space<vmem>>, %arg6: memref<1x1x128xf32, #tpu.memory_space<vmem>>, %arg7: memref<1x1x128xf32, #tpu.memory_space<vmem>>, %arg8: memref<1x1x128xf32, #tpu.memory_space<vmem>>, %arg9: memref<4x16x128xf32, #tpu.memory_space<vmem>>) attributes {dimension_semantics = [#tpu.dimension_semantics<arbitrary>, #tpu.dimension_semantics<arbitrary>], iteration_bounds = array<i64: 1, 1>, scalar_prefetch = 0 : i64, scratch_operands = 1 : i64, tpu.core_type = #tpu.core_type<tc>, window_params = [{transform_indices = @transform_0, window_bounds = array<i64: 4, 16, 64>}, {transform_indices = @transform_1, window_bounds = array<i64: 4, 32, 128>}, {pipeline_mode = #tpu.pipeline_mode<synchronous>, transform_indices = @transform_2, window_bounds = array<i64: 32, 16>}, {pipeline_mode = #tpu.pipeline_mode<synchronous>, transform_indices = @transform_3, window_bounds = array<i64: 64, 128>}, {transform_indices = @transform_4, window_bounds = array<i64: 1, 1, 128>}, {transform_indices = @transform_5, window_bounds = array<i64: 1, 1, 128>}, {transform_indices = @transform_6, window_bounds = array<i64: 1, 1, 128>}]} {
    %c0_i32 = arith.constant 0 : i32
    %0 = arith.cmpi eq, %arg1, %c0_i32 : i32
    %1 = arith.extui %0 : i1 to i32
    %c0_i32_0 = arith.constant 0 : i32
    %2 = arith.cmpi ne, %1, %c0_i32_0 : i32
    scf.if %2 {
      %cst_30 = arith.constant 0.000000e+00 : f32
      %27 = vector.broadcast %cst_30 : f32 to vector<1x128xf32>
      %c0_31 = arith.constant 0 : index
      %c0_32 = arith.constant 0 : index
      %c0_33 = arith.constant 0 : index
      %28 = vector.load %arg6[%c0_31, %c0_32, %c0_33] : memref<1x1x128xf32, #tpu.memory_space<vmem>>, vector<1x1x128xf32>
      %29 = vector.shape_cast %28 : vector<1x1x128xf32> to vector<1x128xf32>
      %30 = vector.shape_cast %27 : vector<1x128xf32> to vector<1x1x128xf32>
      tpu.vector_store %arg6[%c0_31, %c0_32, %c0_33], %30 {strides = array<i32>} : memref<1x1x128xf32, #tpu.memory_space<vmem>>, vector<1x1x128xf32>,
      %cst_34 = arith.constant 0.000000e+00 : f32
      %31 = vector.broadcast %cst_34 : f32 to vector<1x128xf32>
      %c0_35 = arith.constant 0 : index
      %c0_36 = arith.constant 0 : index
      %c0_37 = arith.constant 0 : index
      %32 = vector.load %arg7[%c0_35, %c0_36, %c0_37] : memref<1x1x128xf32, #tpu.memory_space<vmem>>, vector<1x1x128xf32>
      %33 = vector.shape_cast %32 : vector<1x1x128xf32> to vector<1x128xf32>
      %34 = vector.shape_cast %31 : vector<1x128xf32> to vector<1x1x128xf32>
      tpu.vector_store %arg7[%c0_35, %c0_36, %c0_37], %34 {strides = array<i32>} : memref<1x1x128xf32, #tpu.memory_space<vmem>>, vector<1x1x128xf32>,
      %cst_38 = arith.constant 0.000000e+00 : f32
      %35 = vector.broadcast %cst_38 : f32 to vector<1x128xf32>
      %c0_39 = arith.constant 0 : index
      %c0_40 = arith.constant 0 : index
      %c0_41 = arith.constant 0 : index
      %36 = vector.load %arg8[%c0_39, %c0_40, %c0_41] : memref<1x1x128xf32, #tpu.memory_space<vmem>>, vector<1x1x128xf32>
      %37 = vector.shape_cast %36 : vector<1x1x128xf32> to vector<1x128xf32>
      %38 = vector.shape_cast %35 : vector<1x128xf32> to vector<1x1x128xf32>
      tpu.vector_store %arg8[%c0_39, %c0_40, %c0_41], %38 {strides = array<i32>} : memref<1x1x128xf32, #tpu.memory_space<vmem>>, vector<1x1x128xf32>,
    } else {
    }
    %c0 = arith.constant 0 : index
    %c0_1 = arith.constant 0 : index
    %c0_2 = arith.constant 0 : index
    %3 = vector.load %arg2[%c0, %c0_1, %c0_2] : memref<4x16x64xf32, #tpu.memory_space<vmem>>, vector<4x16x64xf32>
    %4 = vector.shape_cast %3 : vector<4x16x64xf32> to vector<64x64xf32>
    %c0_3 = arith.constant 0 : index
    %c0_4 = arith.constant 0 : index
    %5 = vector.load %arg5[%c0_3, %c0_4] : memref<64x128xf32, #tpu.memory_space<vmem>>, vector<64x128xf32>
    %cst = arith.constant dense<0.000000e+00> : vector<64x128xf32>
    %6 = tpu.matmul %4, %5, %cst {dimension_numbers = #tpu.dot_dimension_numbers<[1], [0], [0], [1], [0, 0, 1, 1], [], []>} : vector<64x64xf32>, vector<64x128xf32>, vector<64x128xf32> -> vector<64x128xf32>
    %7 = vector.shape_cast %6 : vector<64x128xf32> to vector<4x16x128xf32>
    %c0_5 = arith.constant 0 : index
    %c0_6 = arith.constant 0 : index
    %c0_7 = arith.constant 0 : index
    %8 = vector.load %arg9[%c0_5, %c0_6, %c0_7] : memref<4x16x128xf32, #tpu.memory_space<vmem>>, vector<4x16x128xf32>
    tpu.vector_store %arg9[%c0_5, %c0_6, %c0_7], %7 {strides = array<i32>} : memref<4x16x128xf32, #tpu.memory_space<vmem>>, vector<4x16x128xf32>,
    %c0_8 = arith.constant 0 : index
    %c0_9 = arith.constant 0 : index
    %9 = vector.load %arg4[%c0_8, %c0_9] : memref<32x16xf32, #tpu.memory_space<vmem>>, vector<32x16xf32>
    %c0_10 = arith.constant 0 : index
    %c0_11 = arith.constant 0 : index
    %c0_12 = arith.constant 0 : index
    %10 = vector.load %arg6[%c0_10, %c0_11, %c0_12] : memref<1x1x128xf32, #tpu.memory_space<vmem>>, vector<1x1x128xf32>
    %11 = vector.shape_cast %10 : vector<1x1x128xf32> to vector<1x128xf32>
    %c0_13 = arith.constant 0 : index
    %c0_14 = arith.constant 0 : index
    %c0_15 = arith.constant 0 : index
    %12 = vector.load %arg7[%c0_13, %c0_14, %c0_15] : memref<1x1x128xf32, #tpu.memory_space<vmem>>, vector<1x1x128xf32>
    %13 = vector.shape_cast %12 : vector<1x1x128xf32> to vector<1x128xf32>
    %c0_16 = arith.constant 0 : index
    %c0_17 = arith.constant 0 : index
    %c0_18 = arith.constant 0 : index
    %14 = vector.load %arg8[%c0_16, %c0_17, %c0_18] : memref<1x1x128xf32, #tpu.memory_space<vmem>>, vector<1x1x128xf32>
    %15 = vector.shape_cast %14 : vector<1x1x128xf32> to vector<1x128xf32>
    %c0_i32_19 = arith.constant 0 : i32
    %c4_i32 = arith.constant 4 : i32
    %16 = arith.addi %c0_i32_19, %c4_i32 : i32
    %c1_i32 = arith.constant 1 : i32
    %17:3 = scf.for %arg10 = %c0_i32_19 to %16 step %c1_i32 iter_args(%arg11 = %11, %arg12 = %13, %arg13 = %15) -> (vector<1x128xf32>, vector<1x128xf32>, vector<1x128xf32>)  : i32 {
      %27 = arith.index_cast %arg10 : i32 to index
      %c0_30 = arith.constant 0 : index
      %c0_31 = arith.constant 0 : index
      %28 = vector.load %arg3[%27, %c0_30, %c0_31] : memref<4x32x128xf32, #tpu.memory_space<vmem>>, vector<1x32x128xf32>
      %29 = vector.shape_cast %28 : vector<1x32x128xf32> to vector<32x128xf32>
      %30 = arith.index_cast %arg10 : i32 to index
      %c0_32 = arith.constant 0 : index
      %c0_33 = arith.constant 0 : index
      %31 = vector.load %arg9[%30, %c0_32, %c0_33] : memref<4x16x128xf32, #tpu.memory_space<vmem>>, vector<1x16x128xf32>
      %32 = vector.shape_cast %31 : vector<1x16x128xf32> to vector<16x128xf32>
      %cst_34 = arith.constant dense<0.000000e+00> : vector<32x128xf32>
      %33 = tpu.matmul %9, %32, %cst_34 {dimension_numbers = #tpu.dot_dimension_numbers<[1], [0], [0], [1], [0, 0, 1, 1], [], []>} : vector<32x16xf32>, vector<16x128xf32>, vector<32x128xf32> -> vector<32x128xf32>
      %cst_35 = arith.constant 0.000000e+00 : f32
      %34 = vector.broadcast %cst_35 : f32 to vector<32x128xf32>
      %35 = arith.cmpf ogt, %29, %34 : vector<32x128xf32>
      %36 = arith.extui %35 : vector<32x128xi1> to vector<32x128xi32>
      %37 = arith.sitofp %36 : vector<32x128xi32> to vector<32x128xf32>
      %cst_36 = arith.constant 9.99999993E-9 : f32
      %38 = vector.broadcast %cst_36 : f32 to vector<32x128xf32>
      %39 = arith.addf %33, %38 : vector<32x128xf32>
      %cst_37 = arith.constant 9.99999993E-9 : f32
      %40 = vector.broadcast %cst_37 : f32 to vector<32x128xf32>
      %41 = arith.addf %29, %40 : vector<32x128xf32>
      %42 = arith.divf %39, %41 : vector<32x128xf32>
      %43 = math.log %42 : vector<32x128xf32>
      %cst_38 = arith.constant 0.000000e+00 : f32
      %44 = vector.broadcast %cst_38 : f32 to vector<32x128xf32>
      %45 = arith.select %35, %43, %44 : vector<32x128xi1>, vector<32x128xf32>
      %46 = arith.mulf %45, %45 : vector<32x128xf32>
      %cst_39 = arith.constant dense<0.000000e+00> : vector<128xf32>
      %47 = vector.multi_reduction <add>, %45, %cst_39 [0] : vector<32x128xf32> to vector<128xf32>
      %48 = vector.shape_cast %47 : vector<128xf32> to vector<1x128xf32>
      %49 = arith.addf %arg11, %48 : vector<1x128xf32>
      %cst_40 = arith.constant dense<0.000000e+00> : vector<128xf32>
      %50 = vector.multi_reduction <add>, %46, %cst_40 [0] : vector<32x128xf32> to vector<128xf32>
      %51 = vector.shape_cast %50 : vector<128xf32> to vector<1x128xf32>
      %52 = arith.addf %arg12, %51 : vector<1x128xf32>
      %cst_41 = arith.constant dense<0.000000e+00> : vector<128xf32>
      %53 = vector.multi_reduction <add>, %37, %cst_41 [0] : vector<32x128xf32> to vector<128xf32>
      %54 = vector.shape_cast %53 : vector<128xf32> to vector<1x128xf32>
      %55 = arith.addf %arg13, %54 : vector<1x128xf32>
      scf.yield %49, %52, %55 : vector<1x128xf32>, vector<1x128xf32>, vector<1x128xf32>
    }
    %c4_i32_20 = arith.constant 4 : i32
    %c0_21 = arith.constant 0 : index
    %c0_22 = arith.constant 0 : index
    %c0_23 = arith.constant 0 : index
    %18 = vector.load %arg6[%c0_21, %c0_22, %c0_23] : memref<1x1x128xf32, #tpu.memory_space<vmem>>, vector<1x1x128xf32>
    %19 = vector.shape_cast %18 : vector<1x1x128xf32> to vector<1x128xf32>
    %20 = vector.shape_cast %17#0 : vector<1x128xf32> to vector<1x1x128xf32>
    tpu.vector_store %arg6[%c0_21, %c0_22, %c0_23], %20 {strides = array<i32>} : memref<1x1x128xf32, #tpu.memory_space<vmem>>, vector<1x1x128xf32>,
    %c0_24 = arith.constant 0 : index
    %c0_25 = arith.constant 0 : index
    %c0_26 = arith.constant 0 : index
    %21 = vector.load %arg7[%c0_24, %c0_25, %c0_26] : memref<1x1x128xf32, #tpu.memory_space<vmem>>, vector<1x1x128xf32>
    %22 = vector.shape_cast %21 : vector<1x1x128xf32> to vector<1x128xf32>
    %23 = vector.shape_cast %17#1 : vector<1x128xf32> to vector<1x1x128xf32>
    tpu.vector_store %arg7[%c0_24, %c0_25, %c0_26], %23 {strides = array<i32>} : memref<1x1x128xf32, #tpu.memory_space<vmem>>, vector<1x1x128xf32>,
    %c0_27 = arith.constant 0 : index
    %c0_28 = arith.constant 0 : index
    %c0_29 = arith.constant 0 : index
    %24 = vector.load %arg8[%c0_27, %c0_28, %c0_29] : memref<1x1x128xf32, #tpu.memory_space<vmem>>, vector<1x1x128xf32>
    %25 = vector.shape_cast %24 : vector<1x1x128xf32> to vector<1x128xf32>
    %26 = vector.shape_cast %17#2 : vector<1x128xf32> to vector<1x1x128xf32>
    tpu.vector_store %arg8[%c0_27, %c0_28, %c0_29], %26 {strides = array<i32>} : memref<1x1x128xf32, #tpu.memory_space<vmem>>, vector<1x1x128xf32>,
    return
  }
  func.func @transform_0(%arg0: i32, %arg1: i32) -> (i32, i32, i32) {
    %c1_i32 = arith.constant 1 : i32
    %0 = arith.muli %arg0, %c1_i32 : i32
    %1 = arith.addi %0, %arg1 : i32
    %c0_i32 = arith.constant 0 : i32
    %c0_i32_0 = arith.constant 0 : i32
    %c0_i32_1 = arith.constant 0 : i32
    return %1, %c0_i32, %c0_i32_0 : i32, i32, i32
  }
  func.func @transform_1(%arg0: i32, %arg1: i32) -> (i32, i32, i32) {
    %c1_i32 = arith.constant 1 : i32
    %0 = arith.muli %arg0, %c1_i32 : i32
    %1 = arith.addi %0, %arg1 : i32
    %c0_i32 = arith.constant 0 : i32
    %c0_i32_0 = arith.constant 0 : i32
    %c0_i32_1 = arith.constant 0 : i32
    return %1, %c0_i32, %c0_i32_0 : i32, i32, i32
  }
  func.func @transform_2(%arg0: i32, %arg1: i32) -> (i32, i32) {
    %c0_i32 = arith.constant 0 : i32
    %c0_i32_0 = arith.constant 0 : i32
    %c0_i32_1 = arith.constant 0 : i32
    return %c0_i32, %c0_i32_0 : i32, i32
  }
  func.func @transform_3(%arg0: i32, %arg1: i32) -> (i32, i32) {
    %c0_i32 = arith.constant 0 : i32
    %c0_i32_0 = arith.constant 0 : i32
    %c0_i32_1 = arith.constant 0 : i32
    return %c0_i32, %c0_i32_0 : i32, i32
  }
  func.func @transform_4(%arg0: i32, %arg1: i32) -> (i32, i32, i32) {
    %c0_i32 = arith.constant 0 : i32
    %c0_i32_0 = arith.constant 0 : i32
    %c0_i32_1 = arith.constant 0 : i32
    return %arg0, %c0_i32, %c0_i32_0 : i32, i32, i32
  }
  func.func @transform_5(%arg0: i32, %arg1: i32) -> (i32, i32, i32) {
    %c0_i32 = arith.constant 0 : i32
    %c0_i32_0 = arith.constant 0 : i32
    %c0_i32_1 = arith.constant 0 : i32
    return %arg0, %c0_i32, %c0_i32_0 : i32, i32, i32
  }
  func.func @transform_6(%arg0: i32, %arg1: i32) -> (i32, i32, i32) {
    %c0_i32 = arith.constant 0 : i32
    %c0_i32_0 = arith.constant 0 : i32
    %c0_i32_1 = arith.constant 0 : i32
    return %arg0, %c0_i32, %c0_i32_0 : i32, i32, i32
  }
}

</mosaic_0001>

<bundles_post_ra>
// kernel: tpu_custom_call.1
= control target key start
LH: loop header
LB: loop body
LE: loop exit
PB: predicated region body
PF: predicated region fallthrough
CT: control target
= control target key end

     0   :  { %12 = vsyncpa [#allocation4], 0  ;;  %s1048_s0 = inlined_call_operand.hbm [shape: f32[4,16,64], index: 0, kind: input, shape index: {}]   ;;  %s1049_s1 = inlined_call_operand.hbm [shape: f32[4,32,128], index: 1, kind: input, shape index: {}]   ;;  %s1050_s2 = inlined_call_operand.vmem [shape: f32[32,16], index: 2, kind: input, shape index: {}]   ;;  %s1051_s3 = inlined_call_operand.hbm [shape: f32[64,128], index: 3, kind: input, shape index: {}]   ;;  %s1052_s4 = inlined_call_operand.hbm [shape: f32[1,1,128], index: 4, kind: output, shape index: {0}]   ;;  %s1053_s5 = inlined_call_operand.hbm [shape: f32[1,1,128], index: 5, kind: output, shape index: {1}]   ;;  %s1054_s6 = inlined_call_operand.hbm [shape: f32[1,1,128], index: 6, kind: output, shape index: {2}]  }
   0x1   :  { %13 = vsyncpa [#allocation7], 0 }
   0x2   :  { %14 = vsyncpa [#allocation5], 0 }
   0x3   :  { %15 = vsyncpa [#allocation11], 0  ;;  %s834_s21 = smov [#allocation6]   ;;  %s835_s23 = smov [#allocation3]  }
   0x4   :  { %s43_s22 = sshll.u32 %s834_s21, 4  ;;  %s26_s24 = sshll.u32 %s835_s23, 4  ;;  %s44_s22 = int_to_ptr.vmem [resolvable:$true] %s43_s22  ;;  %s879_s24 = int_to_ptr.vmem [resolvable:$true] %s26_s24 }
   0x5   :  { %s662_s27 = scalar_lea.hbm %s1049_s1, 2048 }
   0x6   :  { %p663_p0 = scmp.ne.s32.totalorder %s1049_s1, %s662_s27  ;;  %p666_p1 = scmp.lt.u32.totalorder %s662_s27, %s1049_s1 }
   0x8   :  { %p668_p2 = pnand %p666_p1, %p663_p0 }
   0xa   :  { %671 = shalt.err (!%p668_p2)
}
   0xb   :  { %s672_s8 = scalar_lea.vmem %s44_s22, 2048  ;;  %p677_p4 = scmp.lt.s32.totalorder %s44_s22, %s44_s22 }
   0xc   :  { %p673_p3 = scmp.ne.s32.totalorder %s44_s22, %s672_s8  ;;  %p678_p5 = scmp.lt.s32.totalorder %s672_s8, %s672_s8 }
   0xe   :  { %p679_p6 = por %p678_p5, %p677_p4 }
  0x10   :  { %p680_p7 = pnand %p679_p6, %p673_p3 }
  0x12   :  { %683 = shalt.err (!%p680_p7)
}
  0x13   :  { %s836_s9 = smov 128   ;;  %s837_s10 = smov 8  }
  0x14   :  { %49 = dma.hbm_to_vmem [thread:$0]  %s1049_s1, 2048, %s44_s22, [#allocation7], %s836_s9, %s836_s9, %s837_s10  }
  0x15   :  { %s684_s15 = scalar_lea.hbm %s1048_s0, 1024 }
  0x16   :  { %p685_p8 = scmp.ne.s32.totalorder %s1048_s0, %s684_s15  ;;  %p688_p9 = scmp.lt.u32.totalorder %s684_s15, %s1048_s0 }
  0x18   :  { %p690_p10 = pnand %p688_p9, %p685_p8 }
  0x1a   :  { %693 = shalt.err (!%p690_p10)
}
  0x1b   :  { %s694_s20 = scalar_lea.vmem %s879_s24, 1024  ;;  %p699_p12 = scmp.lt.s32.totalorder %s879_s24, %s879_s24 }
  0x1c   :  { %p695_p11 = scmp.ne.s32.totalorder %s879_s24, %s694_s20  ;;  %p700_p13 = scmp.lt.s32.totalorder %s694_s20, %s694_s20 }
  0x1e   :  { %p701_p0 = por %p700_p13, %p699_p12 }
  0x20   :  { %p702_p1 = pnand %p701_p0, %p695_p11 }
  0x22   :  { %705 = shalt.err (!%p702_p1)
}
  0x23   :  { %32 = dma.hbm_to_vmem [thread:$0]  %s1048_s0, 1024, %s879_s24, [#allocation4], %s836_s9, %s836_s9, %s837_s10  }
  0x24   :  { %s838_s22 = smov [#allocation8]   ;;  %s706_s27 = scalar_lea.hbm %s1051_s3, 1024 }
  0x25   :  { %s57_s23 = sshll.u32 %s838_s22, 4  ;;  %p707_p2 = scmp.ne.s32.totalorder %s1051_s3, %s706_s27  ;;  %s58_s23 = int_to_ptr.vmem [resolvable:$true] %s57_s23 }
  0x26   :  { %p710_p3 = scmp.lt.u32.totalorder %s706_s27, %s1051_s3 }
  0x28   :  { %p712_p4 = pnand %p710_p3, %p707_p2 }
  0x2a   :  { %715 = shalt.err (!%p712_p4)
}
  0x2b   :  { %s716_s8 = scalar_lea.vmem %s58_s23, 1024  ;;  %p721_p6 = scmp.lt.s32.totalorder %s58_s23, %s58_s23 }
  0x2c   :  { %p717_p5 = scmp.ne.s32.totalorder %s58_s23, %s716_s8  ;;  %p722_p7 = scmp.lt.s32.totalorder %s716_s8, %s716_s8 }
  0x2e   :  { %p723_p8 = por %p722_p7, %p721_p6 }
  0x30   :  { %p724_p9 = pnand %p723_p8, %p717_p5 }
  0x32   :  { %727 = shalt.err (!%p724_p9)
}
  0x33   :  { %63 = dma.hbm_to_vmem [thread:$0]  %s1051_s3, 1024, %s58_s23, [#allocation7], %s836_s9, %s836_s9, %s837_s10  }
  0x34   :  { %810 = dma.done.wait [#allocation4], 1024  }
  0x35   :  { %811 = vsyncadd [#allocation4], 4294966272 }
  0x36   :  { %812 = dma.done.wait [#allocation7], 3072  }
  0x37   :  { %813 = vsyncadd [#allocation7], 4294964224  ;;  %v839_v0 = vmov 0.0   ;;  %v934_v1 = vld [vmem:[%s1050_s2] sm:$0xff]  ;;  %v939_v2 = vld [vmem:[%s1050_s2 + $0x8] sm:$0xff]  ;;  %vm100_vm0 = vcmask 523264  }
  0x38   :  { %81 = vst [vmem:[#allocation9] sm:$0x1] %v839_v0  ;;  %82 = vst [vmem:[#allocation10] sm:$0x1] %v839_v0  ;;  %v944_v3 = vld [vmem:[%s1050_s2 + $0x10] sm:$0xff]  ;;  %v949_v4 = vld [vmem:[%s1050_s2 + $0x18] sm:$0xff] }
  0x39   :  { %83 = vst [vmem:[#allocation12] sm:$0x1] %v839_v0  ;;  %v92_v8 = vld [vmem:[#allocation8] sm:$0xff]  ;;  %v93_v9 = vld [vmem:[#allocation8 + $0x8] sm:$0xff]  ;;  %v94_v11 = vld [vmem:[#allocation8 + $0x10] sm:$0xff]  ;;  %s971_s2 = smov 0  }
  0x3a   :  { %v574_v10 = vpack.c.bf16 %v93_v9, %v92_v8  ;;  %v95_v12 = vld [vmem:[#allocation8 + $0x18] sm:$0xff]  ;;  %v96_v14 = vld [vmem:[#allocation8 + $0x20] sm:$0xff]  ;;  %v97_v15 = vld [vmem:[#allocation8 + $0x28] sm:$0xff] }
  0x3b   :  { %v578_v13 = vpack.c.bf16 %v95_v12, %v94_v11  ;;  %v84_v16 = vld [vmem:[#allocation3] sm:$0xff]  ;;  %v582_v18 = vpack.c.bf16 %v97_v15, %v96_v14  ;;  %v98_v19 = vld [vmem:[#allocation8 + $0x30] sm:$0xff]  ;;  %v99_v20 = vld [vmem:[#allocation8 + $0x38] sm:$0xff] }
  0x3c   :  { %575 = vmatprep.subr.bf16.mxu0 %v574_v10  ;;  %594 = vmatprep.subr.bf16.mxu1 %v574_v10  ;;  %v88_v17 = vld [vmem:[#allocation3 + $0x20] sm:$0xff]  ;;  %v586_v21 = vpack.c.bf16 %v99_v20, %v98_v19  ;;  %v85_v22 = vld [vmem:[#allocation3 + $0x8] sm:$0xff]  ;;  %v86_v24 = vld [vmem:[#allocation3 + $0x10] sm:$0xff] }
  0x3d   :  { %577 = vmatpush3.bf16.msra.mxu0 %v574_v10  ;;  %598 = vmatpush3.bf16.msra.mxu1 %v574_v10  ;;  %v89_v23 = vld [vmem:[#allocation3 + $0x28] sm:$0xff]  ;;  %v90_v25 = vld [vmem:[#allocation3 + $0x30] sm:$0xff]  ;;  %v87_v26 = vld [vmem:[#allocation3 + $0x18] sm:$0xff] }
  0x3e   :  { %579 = vmatprep.subr.bf16.mxu0 %v578_v13  ;;  %595 = vmatprep.subr.bf16.mxu1 %v578_v13  ;;  %v91_v27 = vld [vmem:[#allocation3 + $0x38] sm:$0xff] }
  0x3f   :  { %v951_v5 = vld [vmem:[#allocation9] sm:$0x1]   ;;  %v953_v6 = vld [vmem:[#allocation10] sm:$0x1]   ;;  %552 = vmatprep.mubr.msk.f32.mxu0 %vm100_vm0, %v84_v16  ;;  %558 = vmatprep.mubr.msk.f32.mxu1 %vm100_vm0, %v88_v17 }
  0x40   :  { %v244_v7 = vld [vmem:[#allocation12] sm:$0x1]  }
  0x41   :  { %581 = vmatpush3.bf16.msra.mxu0 %v578_v13  ;;  %599 = vmatpush3.bf16.msra.mxu1 %v578_v13 }
  0x42   :  { %583 = vmatprep.subr.bf16.mxu0 %v582_v18  ;;  %596 = vmatprep.subr.bf16.mxu1 %v582_v18 }
  0x45   :  { %585 = vmatpush3.bf16.msra.mxu0 %v582_v18  ;;  %600 = vmatpush3.bf16.msra.mxu1 %v582_v18 }
  0x46   :  { %587 = vmatprep.subr.bf16.mxu0 %v586_v21  ;;  %597 = vmatprep.subr.bf16.mxu1 %v586_v21 }
  0x49   :  { %589 = vmatpush3.bf16.msra.mxu0 %v586_v21  ;;  %601 = vmatpush3.bf16.msra.mxu1 %v586_v21 }
  0x4c   :  { %553 = vmatmul.mubr.msk.f32.vlgmr.msra.gmra.mrb[0].mxu0 %vm100_vm0, %v85_v22  ;;  %559 = vmatmul.mubr.msk.f32.vlgmr.msra.gmra.mrb[0].mxu1 %vm100_vm0, %v89_v23 }
  0x4d   :  { %555 = vmatprep.mubr.msk.f32.mxu0 %vm100_vm0, %v86_v24  ;;  %561 = vmatprep.mubr.msk.f32.mxu1 %vm100_vm0, %v90_v25 }
  0x50   :  { %556 = vmatmul.mubr.msk.f32.gmra.mrb[2].mxu0 %vm100_vm0, %v87_v26  ;;  %562 = vmatmul.mubr.msk.f32.gmra.mrb[2].mxu1 %vm100_vm0, %v91_v27 }
 0x11f   :  { %v554_v28 = vpop.f32.mrb[0].mxu0  ;;  %v560_v29 = vpop.f32.mrb[0].mxu1 }
 0x120   :  { %231 = vst [vmem:[#allocation2 + $0x8] sm:$0xff] %v554_v28  ;;  %235 = vst [vmem:[#allocation2 + $0x28] sm:$0xff] %v560_v29  ;;  %v191_v30 = vpop.f32.mrb[1].mxu0  ;;  %v211_v31 = vpop.f32.mrb[1].mxu1 }
 0x121   :  { %230 = vst [vmem:[#allocation2] sm:$0xff] %v191_v30  ;;  %234 = vst [vmem:[#allocation2 + $0x20] sm:$0xff] %v211_v31 }
 0x123   :  { %v557_v32 = vpop.f32.mrb[2].mxu0  ;;  %v563_v33 = vpop.f32.mrb[2].mxu1 }
 0x124   :  { %233 = vst [vmem:[#allocation2 + $0x18] sm:$0xff] %v557_v32  ;;  %237 = vst [vmem:[#allocation2 + $0x38] sm:$0xff] %v563_v33  ;;  %v201_v34 = vpop.f32.mrb[3].mxu0  ;;  %v221_v35 = vpop.f32.mrb[3].mxu1 }
 0x125   :  { %232 = vst [vmem:[#allocation2 + $0x10] sm:$0xff] %v201_v34  ;;  %236 = vst [vmem:[#allocation2 + $0x30] sm:$0xff] %v221_v35 }
 0x126 LB: > { %vm276_vm1 = vcmask 130048   ;;  %s505_s16 = sshll.u32 %s832_s2, 4  ;;  %s504_s18 = sshll.u32 %s832_s2, 5  ;;  %v840_v41 = vmov 0.0   ;;  %s832_s2 = sphi %s971_s2, %s250_s2   ;;  %v828_v5 = vphi %v951_v5, %v1058_v5   ;;  %v824_v6 = vphi %v953_v6, %v1057_v6   ;;  %v820_v7 = vphi %v244_v7, %v1056_v7  }
 0x127   : > { %568 = vmatprep.mubr.msk.f32.mxu0 %vm276_vm1, %v934_v1  ;;  %571 = vmatprep.mubr.msk.f32.mxu1 %vm276_vm1, %v944_v3  ;;  %s261_s17 = scalar_lea.vmem [#allocation2], %s505_s16  ;;  %s255_s19 = scalar_lea.vmem [#allocation6], %s504_s18 }
 0x128   : > { %v257_v39 = vld [vmem:[%s255_s19 + $0x8] sm:$0xff]  ;;  %v256_v40 = vld [vmem:[%s255_s19] sm:$0xff]  ;;  %v258_v44 = vld [vmem:[%s255_s19 + $0x10] sm:$0xff]  ;;  %s250_s2 = sadd.s32 1, %s832_s2  }
 0x129   : > { %vm265_vm2 = vcmp.gt.f32.partialorder %v257_v39, 0.0  ;;  %vm264_vm3 = vcmp.gt.f32.partialorder %v256_v40, 0.0  ;;  %v259_v46 = vld [vmem:[%s255_s19 + $0x18] sm:$0xff]  ;;  %vm266_vm4 = vcmp.gt.f32.partialorder %v258_v44, 0.0  ;;  %v375_v58 = vadd.f32 1e-08, %v257_v39 }
 0x12a   : > { %v507_v42 = vsel %vm265_vm2, 1.0, %v840_v41  ;;  %v506_v43 = vsel %vm264_vm3, 1.0, %v840_v41  ;;  %vm267_vm5 = vcmp.gt.f32.partialorder %v259_v46, 0.0  ;;  %v508_v47 = vsel %vm266_vm4, 1.0, %v840_v41  ;;  %p247_p10 = scmp.ge.s32.totalorder %s250_s2, 4  }
 0x12b   : > { %v422_v45 = vadd.f32 %v507_v42, %v506_v43  ;;  %v509_v48 = vsel %vm267_vm5, 1.0, %v840_v41  ;;  %v374_v59 = vadd.f32 1e-08, %v256_v40  ;;  %v377_v60 = vadd.f32 1e-08, %v259_v46  ;;  %s841_s20 = smov (%p247_p10), [#allocation10]  }
 0x12c   : > { %v262_v36 = vld [vmem:[%s261_s17] sm:$0xff]  ;;  %v263_v37 = vld [vmem:[%s261_s17 + $0x8] sm:$0xff]  ;;  %v376_v61 = vadd.f32 1e-08, %v258_v44  ;;  %646 = vrcp.f32 %v375_v58  ;;  %s451_s1 = sshll.u32 (%p247_p10), %s841_s20, 4  ;;  %s842_s21 = smov (%p247_p10), [#allocation9]   ;;  %s452_s1 = int_to_ptr.vmem [resolvable:$true] %s451_s1 }
 0x12d   : > { %v590_v38 = vpack.c.bf16 %v263_v37, %v262_v36  ;;  %v423_v49 = vadd.f32 %v508_v47, %v422_v45  ;;  %648 = vrcp.f32 %v374_v59  ;;  %s441_s22 = sshll.u32 (%p247_p10), %s842_s21, 4  ;;  %s728_s23 = scalar_lea.vmem (%p247_p10), %s452_s1, 16  ;;  %s442_s22 = int_to_ptr.vmem [resolvable:$true] %s441_s22 }
 0x12e   : > { %650 = vrcp.f32 %v377_v60  ;;  %p729_p11 = scmp.ne.s32.totalorder (%p247_p10), %s452_s1, %s728_s23  ;;  %s732_s25 = scalar_lea.vmem (%p247_p10), %s452_s1, 32 }
 0x12f   : > { %591 = vmatprep.subr.bf16.mxu0 %v590_v38  ;;  %602 = vmatprep.subr.bf16.mxu1 %v590_v38  ;;  %v424_v50 = vadd.f32 %v509_v48, %v423_v49  ;;  %652 = vrcp.f32 %v376_v61  ;;  %p733_p12 = scmp.lt.s32.totalorder (%p247_p10), %s452_s1, %s452_s1  ;;  %p734_p13 = scmp.lt.s32.totalorder (%p247_p10), %s732_s25, %s728_s23 }
 0x130   : > { %593 = vmatpush3.bf16.msra.mxu0 %v590_v38  ;;  %603 = vmatpush3.bf16.msra.mxu1 %v590_v38 }
 0x131   : > { %v425_v51 = vrot.slane %v424_v50, 4  ;;  %p735_p0 = por (%p247_p10), %p734_p13, %p733_p12 }
 0x133   : > { %569 = vmatmul.mubr.msk.f32.vlgmr.msra.gmra.mrb[0].mxu0 %vm276_vm1, %v939_v2  ;;  %572 = vmatmul.mubr.msk.f32.vlgmr.msra.gmra.mrb[0].mxu1 %vm276_vm1, %v949_v4  ;;  %v426_v52 = vadd.f32 %v425_v51, %v424_v50  ;;  %p736_p1 = pnand (%p247_p10), %p735_p0, %p729_p11 }
 0x135   : > { %v427_v53 = vrot.slane %v426_v52, 2 }
 0x136   : > { %v647_v62 = vpop.eup %646 }
 0x137   : > { %v428_v54 = vadd.f32 %v427_v53, %v426_v52  ;;  %v649_v63 = vpop.eup %648 }
 0x138   : > { %v651_v0 = vpop.eup %650 }
 0x139   : > { %v429_v55 = vrot.slane %v428_v54, 1  ;;  %v653_v10 = vpop.eup %652 }
 0x13b   : > { %v430_v56 = vadd.f32 %v429_v55, %v428_v54 }
 0x13d   : > { %v993_v7 = vadd.f32 %v820_v7, %v430_v56  }
 0x13f   : > { %v1055_v57 = vmov %v993_v7 }
 0x140   :  { %434 = vst [vmem:[#allocation12] sm:$0x1] (%p247_p10), %v1055_v57 }
 0x206   : > { %v570_v8 = vpop.f32.mrb[0].mxu0  ;;  %v573_v9 = vpop.f32.mrb[0].mxu1 }
 0x207   : > { %v361_v11 = vadd.f32 1e-08, %v570_v8  ;;  %v355_v12 = vpop.f32.mrb[1].mxu0  ;;  %v371_v13 = vadd.f32 1e-08, %v573_v9  ;;  %v365_v14 = vpop.f32.mrb[1].mxu1 }
 0x208   : > { %v356_v15 = vadd.f32 1e-08, %v355_v12  ;;  %v366_v7 = vadd.f32 1e-08, %v365_v14 }
 0x209   : > { %v381_v16 = vmul.f32 %v647_v62, %v361_v11  ;;  %v385_v17 = vmul.f32 %v651_v0, %v371_v13 }
 0x20a   : > { %v379_v18 = vmul.f32 %v649_v63, %v356_v15  ;;  %v383_v19 = vmul.f32 %v653_v10, %v366_v7  ;;  %v1056_v7 = vmov %v1055_v57 }
 0x20b   : > { %654 = vlog2.f32 %v381_v16 }
 0x20c   : > { %656 = vlog2.f32 %v379_v18 }
 0x20d   : > { %658 = vlog2.f32 %v385_v17 }
 0x20e   : > { %660 = vlog2.f32 %v383_v19 }
 0x215   : > { %v655_v20 = vpop.eup %654 }
 0x216   : > { %v657_v21 = vpop.eup %656  ;;  %v389_v22 = vmul.f32 0.6931472, %v655_v20 }
 0x217   : > { %v659_v23 = vpop.eup %658  ;;  %v387_v24 = vmul.f32 0.6931472, %v657_v21 }
 0x218   : > { %v661_v25 = vpop.eup %660  ;;  %v395_v26 = vsel %vm265_vm2, %v389_v22, 0.0  ;;  %v393_v27 = vmul.f32 0.6931472, %v659_v23 }
 0x219   : > { %v399_v28 = vmul.f32 %v395_v26, %v395_v26  ;;  %v394_v29 = vsel %vm264_vm3, %v387_v24, 0.0  ;;  %v391_v30 = vmul.f32 0.6931472, %v661_v25 }
 0x21a   : > { %v398_v31 = vmul.f32 %v394_v29, %v394_v29  ;;  %v402_v32 = vadd.f32 %v395_v26, %v394_v29  ;;  %v397_v33 = vsel %vm267_vm5, %v393_v27, 0.0 }
 0x21b   : > { %v396_v34 = vsel %vm266_vm4, %v391_v30, 0.0  ;;  %v401_v38 = vmul.f32 %v397_v33, %v397_v33 }
 0x21c   : > { %v412_v35 = vadd.f32 %v399_v28, %v398_v31  ;;  %v400_v36 = vmul.f32 %v396_v34, %v396_v34  ;;  %v403_v37 = vadd.f32 %v402_v32, %v396_v34 }
 0x21e   : > { %v404_v41 = vadd.f32 %v403_v37, %v397_v33  ;;  %v413_v42 = vadd.f32 %v412_v35, %v400_v36 }
 0x220   : > { %v405_v43 = vrot.slane %v404_v41, 4  ;;  %v414_v39 = vadd.f32 %v413_v42, %v401_v38 }
 0x222   : > { %v406_v45 = vadd.f32 %v405_v43, %v404_v41  ;;  %v415_v47 = vrot.slane %v414_v39, 4 }
 0x224   : > { %v407_v48 = vrot.slane %v406_v45, 2  ;;  %v416_v40 = vadd.f32 %v415_v47, %v414_v39 }
 0x226   : > { %v408_v49 = vadd.f32 %v407_v48, %v406_v45  ;;  %v417_v50 = vrot.slane %v416_v40, 2 }
 0x228   : > { %v409_v51 = vrot.slane %v408_v49, 1  ;;  %v418_v52 = vadd.f32 %v417_v50, %v416_v40 }
 0x22a   : > { %v410_v46 = vadd.f32 %v409_v51, %v408_v49  ;;  %v419_v53 = vrot.slane %v418_v52, 1  ;;  %249 = sbr.rel (!%p247_p10) target bundleno = 294 (0x126), region = 79 }
 0x22c   : > { %v411_v44 = vadd.f32 %v828_v5, %v410_v46   ;;  %v420_v54 = vadd.f32 %v419_v53, %v418_v52 }
 0x22e   : > { %v421_v55 = vadd.f32 %v824_v6, %v420_v54   ;;  %v1058_v5 = vmov %v411_v44  ;;  %432 = vst [vmem:[#allocation9] sm:$0x1] (%p247_p10), %v411_v44 }
 0x230   : > { %v1057_v6 = vmov %v421_v55  ;;  %433 = vst [vmem:[#allocation10] sm:$0x1] (%p247_p10), %v421_v55 }
 0x231   :  { %739 = shalt.err (!%p736_p1)
}
 0x232   :  { %s740_s28 = scalar_lea.hbm %s1053_s5, 16 }
 0x233   :  { %p741_p2 = scmp.ne.s32.totalorder %s1053_s5, %s740_s28  ;;  %p744_p3 = scmp.lt.u32.totalorder %s740_s28, %s1053_s5 }
 0x235   :  { %p746_p4 = pnand %p744_p3, %p741_p2 }
 0x237   :  { %749 = shalt.err (!%p746_p4)
}
 0x238   :  { %454 = dma.vmem_to_hbm [thread:$0]  %s452_s1, 16, %s1053_s5, [#allocation11]  }
 0x239   :  { %s750_s11 = scalar_lea.vmem %s442_s22, 16  ;;  %s754_s12 = scalar_lea.vmem %s442_s22, 32 }
 0x23a   :  { %p751_p5 = scmp.ne.s32.totalorder %s442_s22, %s750_s11  ;;  %p755_p6 = scmp.lt.s32.totalorder %s442_s22, %s442_s22 }
 0x23b   :  { %p756_p7 = scmp.lt.s32.totalorder %s754_s12, %s750_s11 }
 0x23d   :  { %p757_p8 = por %p756_p7, %p755_p6 }
 0x23f   :  { %p758_p9 = pnand %p757_p8, %p751_p5 }
 0x241   :  { %761 = shalt.err (!%p758_p9)
}
 0x242   :  { %s762_s15 = scalar_lea.hbm %s1052_s4, 16 }
 0x243   :  { %p763_p10 = scmp.ne.s32.totalorder %s1052_s4, %s762_s15  ;;  %p766_p11 = scmp.lt.u32.totalorder %s762_s15, %s1052_s4 }
 0x245   :  { %p768_p12 = pnand %p766_p11, %p763_p10 }
 0x247   :  { %771 = shalt.err (!%p768_p12)
}
 0x248   :  { %444 = dma.vmem_to_hbm [thread:$0]  %s442_s22, 16, %s1052_s4, [#allocation5]  }
 0x249   :  { %s843_s17 = smov [#allocation12]  }
 0x24a   :  { %s461_s18 = sshll.u32 %s843_s17, 4  ;;  %s462_s18 = int_to_ptr.vmem [resolvable:$true] %s461_s18 }
 0x24b   :  { %s772_s19 = scalar_lea.vmem %s462_s18, 16  ;;  %s776_s20 = scalar_lea.vmem %s462_s18, 32 }
 0x24c   :  { %p773_p13 = scmp.ne.s32.totalorder %s462_s18, %s772_s19  ;;  %p777_p0 = scmp.lt.s32.totalorder %s462_s18, %s462_s18 }
 0x24d   :  { %p778_p1 = scmp.lt.s32.totalorder %s776_s20, %s772_s19 }
 0x24f   :  { %p779_p2 = por %p778_p1, %p777_p0 }
 0x251   :  { %p780_p3 = pnand %p779_p2, %p773_p13 }
 0x253   :  { %783 = shalt.err (!%p780_p3)
}
 0x254   :  { %s784_s23 = scalar_lea.hbm %s1054_s6, 16 }
 0x255   :  { %p785_p4 = scmp.ne.s32.totalorder %s1054_s6, %s784_s23  ;;  %p788_p5 = scmp.lt.u32.totalorder %s784_s23, %s1054_s6 }
 0x257   :  { %p790_p6 = pnand %p788_p5, %p785_p4 }
 0x259   :  { %793 = shalt.err (!%p790_p6)
}
 0x25a   :  { %464 = dma.vmem_to_hbm [thread:$0]  %s462_s18, 16, %s1054_s6, [#allocation11]  }
 0x25b   :  { %814 = dma.done.wait [#allocation5], 16  }
 0x25c   :  { %815 = vsyncadd [#allocation5], 4294967280 }
 0x25d   :  { %816 = dma.done.wait [#allocation11], 32  }
 0x25e   :  { %817 = vsyncadd [#allocation11], 4294967264 }
 0x25f   :  { %474 = vsyncpa [#allocation4], 1 }
 0x260   :  { %475 = vsyncpa [#allocation7], 1 }
 0x261   :  { %476 = vsyncpa [#allocation5], 1 }
 0x262   :  { %477 = vsyncpa [#allocation11], 1 }

</bundles_post_ra>
